<compile_context>
chip_gen: v7x
topology: tpu7x:2x2x1
jax: 0.10.0
libtpu: 0.0.40
codegen_flags: <defaults>
</compile_context>

<pallas_src>
import numpy as np
import jax
import jax.numpy as jnp
from jax.experimental import pallas as pl
from jax.experimental.pallas import tpu as pltpu


def _round_up(x: int, m: int) -> int:
    return ((x + m - 1) // m) * m


def _hann_window(win_length: int) -> np.ndarray:
    # torch.hann_window default is periodic=True
    n = np.arange(win_length, dtype=np.float64)
    return 0.5 - 0.5 * np.cos(2.0 * np.pi * n / win_length)


# ----------------------------------------------------------------------------
# Pallas kernel: per-frame inverse rDFT + synthesis window as ONE MXU matmul.
#   frames[m, :] = [Re(X_m) | Im(X_m)] @ Basis,   M = batch * n_frames
# ----------------------------------------------------------------------------
def _iframe_kernel(x_ref, basis_ref, o_ref):
    o_ref[...] = jnp.dot(
        x_ref[...], basis_ref[...], preferred_element_type=jnp.float32
    ).astype(o_ref.dtype)


class InverseSpectrogramPallas:
    """JAX/Pallas equivalent of torchaudio.transforms.InverseSpectrogram."""

    _TM = 256  # MXU-aligned M tile (rows = frames), good for v6e/v7x 256x256 MXU

    def __init__(self, n_fft=400, win_length=None, hop_length=None, pad=0,
                 normalized=False, center=True, pad_mode="reflect", onesided=True):
        self.n_fft = n_fft
        self.win_length = win_length if win_length is not None else n_fft
        self.hop_length = hop_length if hop_length is not None else self.win_length // 2
        self.pad = pad
        self.normalized = normalized
        self.center = center
        self.pad_mode = pad_mode
        self.onesided = onesided
        if not onesided:
            # TODO(synk): two-sided spectrogram path not implemented (default is onesided=True).
            raise NotImplementedError("onesided=False not supported")

        # Hann window of win_length, center-padded to n_fft (matches torch.istft).
        win = _hann_window(self.win_length)
        if self.win_length < n_fft:
            left = (n_fft - self.win_length) // 2
            w = np.zeros((n_fft,), np.float64)
            w[left:left + self.win_length] = win
            win = w
        self._window_f64 = win                       # (n_fft,) float64 for basis/env
        self.window = win.astype(np.float32)         # (n_fft,)

        # ---- synthesis basis (built once; independent of n_frames) ----------
        N = n_fft
        freq = N // 2 + 1
        n = np.arange(N, dtype=np.float64)
        k = np.arange(freq, dtype=np.float64)
        ang = 2.0 * np.pi * np.outer(k, n) / N       # (freq, N)
        wk = np.full((freq, 1), 2.0)
        wk[0, 0] = 1.0
        if N % 2 == 0:
            wk[-1, 0] = 1.0
        ccos = (wk * np.cos(ang)) / N                # irfft cosine basis
        csin = (-wk * np.sin(ang)) / N               # irfft sine basis
        basis = np.concatenate([ccos * self._window_f64[None, :],
                                csin * self._window_f64[None, :]], axis=0)  # (2*freq, N)

        self.freq = freq
        self.k_pad = _round_up(2 * freq, 128)        # lane dim of X / sublane of basis
        self.n_pad = _round_up(N, 128)               # lane dim of basis / output
        basis_p = np.zeros((self.k_pad, self.n_pad), np.float32)
        basis_p[:2 * freq, :N] = basis.astype(np.float32)
        self.basis = jnp.asarray(basis_p)            # (K_pad, N_pad), cached

        self._inv_env_cache = {}

    # Inverse squared-window overlap envelope (depends only on n_frames); cached.
    def _inv_envelope(self, n_frames: int):
        if n_frames not in self._inv_env_cache:
            n_fft, hop = self.n_fft, self.hop_length
            out_len = n_fft + hop * (n_frames - 1)
            env = np.zeros((out_len,), np.float64)
            wsq = self._window_f64 ** 2
            for t in range(n_frames):
                env[t * hop:t * hop + n_fft] += wsq
            inv = np.where(env > 1e-11, 1.0 / np.maximum(env, 1e-30), 1.0)
            self._inv_env_cache[n_frames] = jnp.asarray(inv.astype(np.float32))
        return self._inv_env_cache[n_frames]

    def _synth_frames(self, x_packed):
        """x_packed: (M_pad, K_pad) f32  ->  windowed frames (M_pad, N_pad) f32."""
        tm = self._TM
        m_pad = x_packed.shape[0]
        return pl.pallas_call(
            _iframe_kernel,
            out_shape=jax.ShapeDtypeStruct((m_pad, self.n_pad), jnp.float32),
            grid_spec=pltpu.PrefetchScalarGridSpec(
                num_scalar_prefetch=0,
                grid=(m_pad // tm,),
                in_specs=[
                    pl.BlockSpec((tm, self.k_pad), lambda i: (i, 0)),
                    pl.BlockSpec((self.k_pad, self.n_pad), lambda i: (0, 0)),
                ],
                out_specs=pl.BlockSpec((tm, self.n_pad), lambda i: (i, 0)),
            ),
            compiler_params=pltpu.CompilerParams(
                dimension_semantics=("parallel",)),
        )(x_packed, self.basis)

    def __call__(self, spectrogram, length=None):
        spec = spectrogram
        # undo STFT normalization (matches F.inverse_spectrogram)
        if self.normalized is True or self.normalized == "window":
            spec = spec * float(np.sqrt(np.sum(self._window_f64 ** 2)))
        elif self.normalized == "frame_length":
            spec = spec * float(self.win_length ** 0.5)

        lead_shape = spec.shape[:-2]
        freq, n_frames = spec.shape[-2], spec.shape[-1]
        assert freq == self.freq, (freq, self.freq)
        spec = spec.reshape((-1, freq, n_frames))
        batch = spec.shape[0]
        n_fft, hop = self.n_fft, self.hop_length

        # pack [Re | Im] along K, frames along M  -> (batch*T, 2*freq)
        xr = jnp.real(spec).transpose(0, 2, 1).astype(jnp.float32)
        xi = jnp.imag(spec).transpose(0, 2, 1).astype(jnp.float32)
        x = jnp.concatenate([xr, xi], axis=-1).reshape(batch * n_frames, 2 * freq)

        m = batch * n_frames
        m_pad = _round_up(m, self._TM)
        x = jnp.pad(x, ((0, m_pad - m), (0, self.k_pad - 2 * freq)))

        frames_p = self._synth_frames(x)                       # (M_pad, N_pad)

        # ---- overlap-add as r = ceil(n_fft/hop) static shifted adds ---------
        frames = frames_p[:m].reshape(batch, n_frames, self.n_pad)
        r = -(-n_fft // hop)
        frame_len = r * hop
        if frame_len <= self.n_pad:
            frames = frames[:, :, :frame_len]      # columns >= n_fft are exactly 0
        else:
            frames = jnp.pad(frames, ((0, 0), (0, 0), (0, frame_len - self.n_pad)))
        chunks = frames.reshape(batch, n_frames, r, hop)
        ola = jnp.zeros((batch, n_frames + r - 1, hop), jnp.float32)
        for j in range(r):
            ola = ola.at[:, j:j + n_frames, :].add(chunks[:, :, j, :])
        out_len = n_fft + hop * (n_frames - 1)
        wav = ola.reshape(batch, (n_frames + r - 1) * hop)[:, :out_len]
        wav = wav * self._inv_envelope(n_frames)[None, :]

        if self.center:
            half = n_fft // 2
            wav = wav[:, half:out_len - half]

        expected = None if length is None else length + 2 * self.pad
        if expected is not None:
            cur = wav.shape[1]
            if cur > expected:
                wav = wav[:, :expected]
            elif cur < expected:
                wav = jnp.pad(wav, ((0, 0), (0, expected - cur)))
        if length is not None and self.pad > 0:
            wav = wav[:, self.pad:-self.pad]

        return wav.reshape(lead_shape + wav.shape[-1:])


# ----------------------------------------------------------------------------
# pure-JAX reference (jnp.fft.irfft + explicit overlap-add) for checking
# ----------------------------------------------------------------------------
def reference_istft(spec, n_fft, hop, window, center, length):
    frames = jnp.fft.irfft(spec, n=n_fft, axis=1)            # (B, n_fft, T)
    frames = frames * window[None, :, None]
    b, _, t = frames.shape
    out_len = n_fft + hop * (t - 1)
    y = jnp.zeros((b, out_len), jnp.float32)
    env = jnp.zeros((out_len,), jnp.float32)
    for ti in range(t):
        y = y.at[:, ti * hop:ti * hop + n_fft].add(frames[:, :, ti])
        env = env.at[ti * hop:ti * hop + n_fft].add(window ** 2)
    y = y / jnp.where(env > 1e-11, env, 1.0)
    if center:
        y = y[:, n_fft // 2:out_len - n_fft // 2]
    if length is not None:
        y = y[:, :length]
    return y


if __name__ == "__main__":
    key = jax.random.PRNGKey(0)
    n_fft = 16
    batch, freq, time = 3, n_fft // 2 + 1, 100   # M = batch*T = 300 -> 2 grid tiles
    length = 780

    kr, ki = jax.random.split(key)
    spec_r = jax.random.normal(kr, (batch, freq, time), jnp.float32)
    spec_i = jax.random.normal(ki, (batch, freq, time), jnp.float32)
    spectrogram = (spec_r + 1j * spec_i).astype(jnp.complex64)

    transform = InverseSpectrogramPallas(n_fft=n_fft)
    waveform = transform(spectrogram, length)
    waveform = jax.block_until_ready(waveform)

    ref = reference_istft(spectrogram, n_fft, transform.hop_length,
                          jnp.asarray(transform.window), transform.center, length)

    assert waveform.shape == (batch, length), waveform.shape
    np.testing.assert_allclose(np.asarray(waveform), np.asarray(ref),
                               rtol=2e-2, atol=2e-2)
    print("KERNEL_OK")
</pallas_src>

<mosaic_0001>
module attributes {stable_mosaic.version = 11 : i64} {
  func.func @_iframe_kernel(%arg0: i32, %arg1: memref<256x128xf32, #tpu.memory_space<vmem>>, %arg2: memref<128x128xf32, #tpu.memory_space<vmem>>, %arg3: memref<256x128xf32, #tpu.memory_space<vmem>>) attributes {dimension_semantics = [#tpu.dimension_semantics<parallel>], iteration_bounds = array<i64: 2>, scalar_prefetch = 0 : i64, scratch_operands = 0 : i64, tpu.core_type = #tpu.core_type<tc>, window_params = [{transform_indices = @transform_0, window_bounds = array<i64: 256, 128>}, {pipeline_mode = #tpu.pipeline_mode<synchronous>, transform_indices = @transform_1, window_bounds = array<i64: 128, 128>}, {transform_indices = @transform_2, window_bounds = array<i64: 256, 128>}]} {
    %c0 = arith.constant 0 : index
    %c0_0 = arith.constant 0 : index
    %0 = vector.load %arg1[%c0, %c0_0] : memref<256x128xf32, #tpu.memory_space<vmem>>, vector<256x128xf32>
    %c0_1 = arith.constant 0 : index
    %c0_2 = arith.constant 0 : index
    %1 = vector.load %arg2[%c0_1, %c0_2] : memref<128x128xf32, #tpu.memory_space<vmem>>, vector<128x128xf32>
    %cst = arith.constant dense<0.000000e+00> : vector<256x128xf32>
    %2 = tpu.matmul %0, %1, %cst {dimension_numbers = #tpu.dot_dimension_numbers<[1], [0], [0], [1], [0, 0, 1, 1], [], []>} : vector<256x128xf32>, vector<128x128xf32>, vector<256x128xf32> -> vector<256x128xf32>
    %c0_3 = arith.constant 0 : index
    %c0_4 = arith.constant 0 : index
    %3 = vector.load %arg3[%c0_3, %c0_4] : memref<256x128xf32, #tpu.memory_space<vmem>>, vector<256x128xf32>
    tpu.vector_store %arg3[%c0_3, %c0_4], %2 {strides = array<i32>} : memref<256x128xf32, #tpu.memory_space<vmem>>, vector<256x128xf32>,
    return
  }
  func.func @transform_0(%arg0: i32) -> (i32, i32) {
    %c0_i32 = arith.constant 0 : i32
    %c0_i32_0 = arith.constant 0 : i32
    return %arg0, %c0_i32 : i32, i32
  }
  func.func @transform_1(%arg0: i32) -> (i32, i32) {
    %c0_i32 = arith.constant 0 : i32
    %c0_i32_0 = arith.constant 0 : i32
    %c0_i32_1 = arith.constant 0 : i32
    return %c0_i32, %c0_i32_0 : i32, i32
  }
  func.func @transform_2(%arg0: i32) -> (i32, i32) {
    %c0_i32 = arith.constant 0 : i32
    %c0_i32_0 = arith.constant 0 : i32
    return %arg0, %c0_i32 : i32, i32
  }
}

</mosaic_0001>

<bundles_post_ra>
// kernel: tpu_custom_call.1
= control target key start
LH: loop header
LB: loop body
LE: loop exit
PB: predicated region body
PF: predicated region fallthrough
CT: control target
= control target key end

     0   :  { %7 = vsyncpa [#allocation3], 0  ;;  %s1268_s0 = inlined_call_operand.hbm [shape: f32[512,128], index: 0, kind: input, shape index: {}]   ;;  %s1269_s1 = inlined_call_operand.hbm [shape: f32[128,128], index: 1, kind: input, shape index: {}]   ;;  %s1270_s2 = inlined_call_operand.hbm [shape: f32[512,128], index: 2, kind: output, shape index: {}]  }
   0x1   :  { %9 = vsyncpa [#allocation3 + $0x1], 0 }
   0x2   :  { %10 = vsyncpa [#allocation6], 0 }
   0x3   :  { %11 = vsyncpa [#allocation4], 0 }
   0x4   :  { %13 = vsyncpa [#allocation4 + $0x1], 0  ;;  %s988_s9 = smov 0   ;;  %s990_s10 = smov 0  }
   0x5   :  { %s992_s11 = smov 0   ;;  %s994_s12 = smov 0  }
   0x6 LB: > { %s1009_s13 = sadd.s32 4294967295, %s964_s12   ;;  %s581_s14 = sadd.s32 4294967294, %s964_s12   ;;  %s964_s12 = sphi %s994_s12, %s1290_s12   ;;  %s960_s11 = sphi %s992_s11, %s1289_s11   ;;  %s956_s10 = sphi %s990_s10, %s1288_s10   ;;  %s952_s9 = sphi %s988_s9, %s1287_s9  }
   0x7   : > { %p39_p0 = scmp.ne.s32.totalorder %s956_s10, %s952_s9  ;;  %p1271_p1 = scmp.eq.s32.totalorder %s1009_s13, 0 }
   0x8   : > { %p90_p3 = scmp.eq.s32.totalorder %s581_s14, 1  ;;  %p582_p5 = scmp.ge.s32.totalorder %s964_s12, 1 }
   0x9   : > { %p1018_p4 = por %p1271_p1, %p39_p0  ;;  %p97_p7 = scmp.lt.s32.totalorder %s964_s12, 3 }
   0xa   : > { %p1023_p6 = por %p90_p3, %p39_p0  ;;  %s966_s18 = smov [#allocation5]  }
   0xb   : > { %s1274_s15 = scalar_select %p1018_p4, 1, 0 }
   0xc   : > { %s1275_s16 = scalar_select %p1023_p6, 1, 0 }
   0xd   : > { %p1028_p8 = pnand %p582_p5, %p97_p7  ;;  %s109_s19 = sshll.u32 %s966_s18, 4  ;;  %s1032_s19 = int_to_ptr.vmem [resolvable:$true] %s109_s19 }
   0xe   : > { %s1044_s21 = sadd.s32 1, %s964_s12   ;;  %s26_s22 = sadd.s32 1, %s960_s11 }
   0xf   : > { %s1276_s17 = scalar_select %p1028_p8, 1, 0 }
  0x10   : > { %p783_p9 = pneg %p1028_p8  ;;  %s23_s23 = ssub.s32 %s964_s12, %s1044_s21 }
  0x11   : > { %s836_s26 = scalar_lea.hbm %s1269_s1, 2048 }
  0x12   : > { %p1039_p11 = pnand %p783_p9, %p1271_p1  ;;  %p837_p12 = scmp.ne.s32.totalorder %s1269_s1, %s836_s26 }
  0x13   : > { %p843_p5 = scmp.lt.u32.totalorder %s836_s26, %s1269_s1 }
  0x14   : > { %p838_p13 = pneg %p1039_p11 }
  0x16   : > { %p839_p0 = pnand %p838_p13, %p837_p12 }
  0x18   : > { %p840_p3 = pneg %p839_p0 }
  0x1a   : > { %p845_p7 = pnand %p843_p5, %p840_p3 }
  0x1c   : > { %848 = shalt.err (!%p845_p7)
}
  0x1d   : > { %s849_s3 = scalar_lea.vmem %s1032_s19, 2048  ;;  %p857_p2 = scmp.lt.s32.totalorder %s1032_s19, %s1032_s19 }
  0x1e   : > { %p850_p9 = scmp.ne.s32.totalorder %s1032_s19, %s849_s3  ;;  %p858_p6 = scmp.lt.s32.totalorder %s849_s3, %s849_s3 }
  0x20   : > { %p852_p10 = pnand %p850_p9, %p838_p13  ;;  %p859_p4 = por %p858_p6, %p857_p2 }
  0x22   : > { %p853_p1 = pneg %p852_p10 }
  0x24   : > { %p860_p8 = pnand %p859_p4, %p853_p1 }
  0x26   : > { %863 = shalt.err (!%p860_p8)
}
  0x27   : > { %s967_s4 = smov 128   ;;  %s968_s5 = smov 8  }
  0x28   : > { %786 = dma.hbm_to_vmem [thread:$0]  (!%p1039_p11), %s1269_s1, 2048, %s1032_s19, [#allocation6], %s967_s4, %s967_s4, %s968_s5  }
  0x29   : > { %p24_p1 = scmp.eq.s32.totalorder %s23_s23, 0  ;;  %p33_p2 = scmp.ne.s32.totalorder %s960_s11, %s956_s10 }
  0x2a   : > { %p34_p4 = scmp.eq.s32.totalorder %s964_s12, 0  ;;  %p796_p6 = scmp.lt.s32.totalorder %s964_s12, 2 }
  0x2b   : > { %s1078_s8 = scalar_select %p24_p1, %s960_s11, %s26_s22  }
  0x2c   : > { %p35_p8 = por %p34_p4, %p33_p2  ;;  %p1278_p10 = scmp.eq.s32.totalorder %s1009_s13, 1 }
  0x2d   : > { %s123_s18 = sand.u32 1, %s960_s11   ;;  %s597_s20 = sshll.u32 %s964_s12, 12 }
  0x2e   : > { %p1082_p12 = por %p1278_p10, %p33_p2  ;;  %s585_s24 = sshll.u32 %s123_s18, 8 }
  0x2f   : > { %s1091_s27 = scalar_lea.hbm %s1268_s0, %s597_s20  ;;  %s127_s19 = scalar_lea.vmem [#allocation2], %s585_s24 }
  0x30   : > { %s134_s22 = sshll.u32 %s127_s19, 4  ;;  %p1093_p11 = pnand %p796_p6, %p35_p8  ;;  %s1097_s22 = int_to_ptr.vmem [resolvable:$true] %s134_s22 }
  0x31   : > { %s1099_s28 = scalar_lea.sflag [#allocation3], %s123_s18  ;;  %s864_s29 = scalar_lea.hbm %s1091_s27, 4096 }
  0x32   : > { %p865_p13 = scmp.ne.s32.totalorder %s1091_s27, %s864_s29  ;;  %p866_p0 = pneg %p1093_p11 }
  0x33   : > { %s869_s6 = scalar_lea.hbm %s1268_s0, 8192  ;;  %p870_p7 = scmp.lt.u32.totalorder %s1091_s27, %s1268_s0 }
  0x34   : > { %p867_p3 = pnand %p866_p0, %p865_p13  ;;  %p871_p9 = scmp.lt.u32.totalorder %s869_s6, %s864_s29 }
  0x35   : > { %p873_p2 = scmp.lt.u32.totalorder %s864_s29, %s1091_s27 }
  0x36   : > { %p868_p5 = pneg %p867_p3  ;;  %p872_p1 = por %p871_p9, %p870_p7 }
  0x38   : > { %p874_p4 = por %p873_p2, %p872_p1 }
  0x3a   : > { %p875_p6 = pnand %p874_p4, %p868_p5 }
  0x3c   : > { %878 = shalt.err (!%p875_p6)
}
  0x3d   : > { %s879_s18 = scalar_lea.vmem %s1097_s22, 4096  ;;  %s969_s24 = smov [#allocation2]  }
  0x3e   : > { %p880_p8 = scmp.ne.s32.totalorder %s1097_s22, %s879_s18  ;;  %s884_s25 = sshll.u32 %s969_s24, 4  ;;  %s885_s25 = int_to_ptr.vmem [resolvable:$false] %s884_s25 }
  0x3f   : > { %s886_s26 = scalar_lea.vmem %s885_s25, 8192  ;;  %p887_p3 = scmp.lt.s32.totalorder %s1097_s22, %s885_s25 }
  0x40   : > { %p882_p10 = pnand %p880_p8, %p866_p0  ;;  %p888_p7 = scmp.lt.s32.totalorder %s886_s26, %s879_s18 }
  0x42   : > { %p883_p13 = pneg %p882_p10  ;;  %p889_p9 = por %p888_p7, %p887_p3 }
  0x44   : > { %p890_p1 = pnand %p889_p9, %p883_p13 }
  0x46   : > { %893 = shalt.err (!%p890_p1)
}
  0x47   : > { %790 = dma.hbm_to_vmem [thread:$0]  (!%p1093_p11), %s1091_s27, 4096, %s1097_s22, %s1099_s28, %s967_s4, %s967_s4, %s968_s5  }
  0x48   : > { %p1281_p0 = scmp.ne.s32.totalorder %s1276_s17, 0 }
  0x49   : > { %s1133_s19 = sand.u32 (!%p1281_p0), 1, %s956_s10   ;;  %p1282_p5 = scmp.ne.s32.totalorder (!%p1281_p0), %s1274_s15, 0 }
  0x4a   : > { %146 = sbr.rel (%p1281_p0) target bundleno = 376 (0x178), region = 28  ;;  %s589_s29 = sshll.u32 (!%p1281_p0), %s1133_s19, 8 }
  0x4b   : > { %s149_s30 = scalar_lea.sflag (!%p1281_p0), [#allocation3], %s1133_s19  ;;  %s1139_s23 = scalar_lea.vmem (!%p1281_p0), [#allocation2], %s589_s29 }
  0x51   : > { %939 = dma.done.wait (%p1282_p5), %s149_s30, 4096  }
  0x52   : > { %941 = vsyncadd (%p1282_p5), %s149_s30, 4294963200  ;;  %p1283_p11 = scmp.eq.s32.totalorder %s1009_s13, 0 }
  0x54   : > { %943 = dma.done.wait (%p1283_p11), [#allocation6], 2048   ;;  %p1284_p2 = pmov %p1283_p11 }
  0x55   : > { %v211_v0 = vld [vmem:[#allocation5] sm:$0xff]  ;;  %v212_v1 = vld [vmem:[#allocation5 + $0x8] sm:$0xff]  ;;  %v213_v2 = vld [vmem:[#allocation5 + $0x10] sm:$0xff]  ;;  %s1183_s15 = scalar_lea.vmem [#allocation7], %s589_s29  ;;  %s598_s17 = sshll.u32 %s1009_s13, 12 }
  0x56   : > { %945 = vsyncadd (%p1284_p2), [#allocation6], 4294965248  ;;  %v727_v3 = vpack.c.bf16 %v212_v1, %v211_v0  ;;  %v214_v4 = vld [vmem:[#allocation5 + $0x18] sm:$0xff]  ;;  %v215_v6 = vld [vmem:[#allocation5 + $0x20] sm:$0xff]  ;;  %s498_s4 = sshll.u32 %s1183_s15, 4  ;;  %s1218_s22 = scalar_lea.hbm %s1270_s2, %s598_s17  ;;  %s1220_s4 = int_to_ptr.vmem [resolvable:$true] %s498_s4 }
  0x57   : > { %v731_v5 = vpack.c.bf16 %v214_v4, %v213_v2  ;;  %v216_v7 = vld [vmem:[#allocation5 + $0x28] sm:$0xff]  ;;  %v179_v9 = vld [vmem:[%s1139_s23] sm:$0xff]  ;;  %v217_v11 = vld [vmem:[#allocation5 + $0x30] sm:$0xff]  ;;  %s485_s13 = scalar_lea.sflag [#allocation4], %s1133_s19  ;;  %s894_s28 = scalar_lea.vmem %s1220_s4, 4096 }
  0x58   : > { %728 = vmatprep.subr.bf16.mxu0 %v727_v3  ;;  %759 = vmatprep.subr.bf16.mxu1 %v727_v3  ;;  %v735_v8 = vpack.c.bf16 %v216_v7, %v215_v6  ;;  %v195_v10 = vld [vmem:[%s1139_s23 + $0x80] sm:$0xff]  ;;  %v218_v12 = vld [vmem:[#allocation5 + $0x38] sm:$0xff]  ;;  %v220_v15 = vld [vmem:[#allocation5 + $0x48] sm:$0xff]  ;;  %p895_p4 = scmp.ne.s32.totalorder %s1220_s4, %s894_s28  ;;  %s970_s3 = smov [#allocation7]  }
  0x59   : > { %730 = vmatpush3.bf16.msra.mxu0 %v727_v3  ;;  %767 = vmatpush3.bf16.msra.mxu1 %v727_v3  ;;  %v739_v13 = vpack.c.bf16 %v218_v12, %v217_v11  ;;  %v219_v14 = vld [vmem:[#allocation5 + $0x40] sm:$0xff]  ;;  %v221_v17 = vld [vmem:[#allocation5 + $0x50] sm:$0xff]  ;;  %v222_v18 = vld [vmem:[#allocation5 + $0x58] sm:$0xff]  ;;  %s898_s6 = sshll.u32 %s970_s3, 4  ;;  %s899_s6 = int_to_ptr.vmem [resolvable:$false] %s898_s6 }
  0x5a   : > { %732 = vmatprep.subr.bf16.mxu0 %v731_v5  ;;  %760 = vmatprep.subr.bf16.mxu1 %v731_v5  ;;  %v743_v16 = vpack.c.bf16 %v220_v15, %v219_v14  ;;  %v747_v19 = vpack.c.bf16 %v222_v18, %v221_v17  ;;  %v223_v20 = vld [vmem:[#allocation5 + $0x60] sm:$0xff]  ;;  %v224_v21 = vld [vmem:[#allocation5 + $0x68] sm:$0xff]  ;;  %v225_v23 = vld [vmem:[#allocation5 + $0x70] sm:$0xff]  ;;  %p896_p6 = pnand %p895_p4, %p1082_p12  ;;  %s900_s7 = scalar_lea.vmem %s899_s6, 8192 }
  0x5b   : > { %679 = vmatprep.mubr.f32.mxu0 %v179_v9  ;;  %703 = vmatprep.mubr.f32.mxu1 %v195_v10  ;;  %v751_v22 = vpack.c.bf16 %v224_v21, %v223_v20  ;;  %v226_v24 = vld [vmem:[#allocation5 + $0x78] sm:$0xff]  ;;  %v180_v26 = vld [vmem:[%s1139_s23 + $0x8] sm:$0xff]  ;;  %v181_v28 = vld [vmem:[%s1139_s23 + $0x10] sm:$0xff]  ;;  %p901_p10 = scmp.lt.s32.totalorder %s1220_s4, %s899_s6  ;;  %p902_p13 = scmp.lt.s32.totalorder %s900_s7, %s894_s28 }
  0x5c   : > { %v755_v25 = vpack.c.bf16 %v226_v24, %v225_v23  ;;  %v196_v27 = vld [vmem:[%s1139_s23 + $0x88] sm:$0xff]  ;;  %v197_v29 = vld [vmem:[%s1139_s23 + $0x90] sm:$0xff]  ;;  %v182_v30 = vld [vmem:[%s1139_s23 + $0x18] sm:$0xff]  ;;  %p897_p8 = pneg %p896_p6 }
  0x5d   : > { %734 = vmatpush3.bf16.msra.mxu0 %v731_v5  ;;  %768 = vmatpush3.bf16.msra.mxu1 %v731_v5  ;;  %v198_v31 = vld [vmem:[%s1139_s23 + $0x98] sm:$0xff]  ;;  %v183_v32 = vld [vmem:[%s1139_s23 + $0x20] sm:$0xff]  ;;  %v184_v34 = vld [vmem:[%s1139_s23 + $0x28] sm:$0xff]  ;;  %p903_p3 = por %p902_p13, %p901_p10 }
  0x5e   : > { %736 = vmatprep.subr.bf16.mxu0 %v735_v8  ;;  %761 = vmatprep.subr.bf16.mxu1 %v735_v8  ;;  %v199_v33 = vld [vmem:[%s1139_s23 + $0xa0] sm:$0xff]  ;;  %v200_v35 = vld [vmem:[%s1139_s23 + $0xa8] sm:$0xff]  ;;  %v185_v36 = vld [vmem:[%s1139_s23 + $0x30] sm:$0xff] }
  0x5f   : > { %v201_v37 = vld [vmem:[%s1139_s23 + $0xb0] sm:$0xff]  ;;  %v186_v38 = vld [vmem:[%s1139_s23 + $0x38] sm:$0xff]  ;;  %v187_v40 = vld [vmem:[%s1139_s23 + $0x40] sm:$0xff]  ;;  %p904_p7 = pnand %p903_p3, %p897_p8 }
  0x60   : > { %v202_v39 = vld [vmem:[%s1139_s23 + $0xb8] sm:$0xff]  ;;  %v203_v41 = vld [vmem:[%s1139_s23 + $0xc0] sm:$0xff]  ;;  %v188_v42 = vld [vmem:[%s1139_s23 + $0x48] sm:$0xff] }
  0x61   : > { %738 = vmatpush3.bf16.msra.mxu0 %v735_v8  ;;  %769 = vmatpush3.bf16.msra.mxu1 %v735_v8  ;;  %v204_v43 = vld [vmem:[%s1139_s23 + $0xc8] sm:$0xff]  ;;  %v189_v44 = vld [vmem:[%s1139_s23 + $0x50] sm:$0xff]  ;;  %v190_v46 = vld [vmem:[%s1139_s23 + $0x58] sm:$0xff] }
  0x62   : > { %740 = vmatprep.subr.bf16.mxu0 %v739_v13  ;;  %762 = vmatprep.subr.bf16.mxu1 %v739_v13  ;;  %v205_v45 = vld [vmem:[%s1139_s23 + $0xd0] sm:$0xff]  ;;  %v206_v47 = vld [vmem:[%s1139_s23 + $0xd8] sm:$0xff]  ;;  %v191_v48 = vld [vmem:[%s1139_s23 + $0x60] sm:$0xff] }
  0x63   : > { %v207_v49 = vld [vmem:[%s1139_s23 + $0xe0] sm:$0xff]  ;;  %v192_v50 = vld [vmem:[%s1139_s23 + $0x68] sm:$0xff]  ;;  %v193_v52 = vld [vmem:[%s1139_s23 + $0x70] sm:$0xff] }
  0x64   : > { %v208_v51 = vld [vmem:[%s1139_s23 + $0xe8] sm:$0xff]  ;;  %v209_v53 = vld [vmem:[%s1139_s23 + $0xf0] sm:$0xff]  ;;  %v194_v54 = vld [vmem:[%s1139_s23 + $0x78] sm:$0xff] }
  0x65   : > { %742 = vmatpush3.bf16.msra.mxu0 %v739_v13  ;;  %770 = vmatpush3.bf16.msra.mxu1 %v739_v13  ;;  %v210_v55 = vld [vmem:[%s1139_s23 + $0xf8] sm:$0xff] }
  0x66   : > { %744 = vmatprep.subr.bf16.mxu0 %v743_v16  ;;  %763 = vmatprep.subr.bf16.mxu1 %v743_v16 }
  0x69   : > { %746 = vmatpush3.bf16.msra.mxu0 %v743_v16  ;;  %771 = vmatpush3.bf16.msra.mxu1 %v743_v16 }
  0x6a   : > { %748 = vmatprep.subr.bf16.mxu0 %v747_v19  ;;  %764 = vmatprep.subr.bf16.mxu1 %v747_v19 }
  0x6d   : > { %750 = vmatpush3.bf16.msra.mxu0 %v747_v19  ;;  %772 = vmatpush3.bf16.msra.mxu1 %v747_v19 }
  0x6e   : > { %752 = vmatprep.subr.bf16.mxu0 %v751_v22  ;;  %765 = vmatprep.subr.bf16.mxu1 %v751_v22 }
  0x71   : > { %754 = vmatpush3.bf16.msra.mxu0 %v751_v22  ;;  %773 = vmatpush3.bf16.msra.mxu1 %v751_v22 }
  0x72   : > { %756 = vmatprep.subr.bf16.mxu0 %v755_v25  ;;  %766 = vmatprep.subr.bf16.mxu1 %v755_v25 }
  0x75   : > { %758 = vmatpush3.bf16.msra.mxu0 %v755_v25  ;;  %774 = vmatpush3.bf16.msra.mxu1 %v755_v25 }
  0x78   : > { %680 = vmatmul.mubr.f32.vlgmr.msra.gmra.mrb[0].mxu0 %v180_v26  ;;  %704 = vmatmul.mubr.f32.vlgmr.msra.gmra.mrb[0].mxu1 %v196_v27 }
  0x79   : > { %682 = vmatprep.mubr.f32.mxu0 %v181_v28  ;;  %706 = vmatprep.mubr.f32.mxu1 %v197_v29 }
  0x7c   : > { %683 = vmatmul.mubr.f32.gmra.mrb[2].mxu0 %v182_v30  ;;  %707 = vmatmul.mubr.f32.gmra.mrb[2].mxu1 %v198_v31 }
  0x7d   : > { %685 = vmatprep.mubr.f32.mxu0 %v183_v32  ;;  %709 = vmatprep.mubr.f32.mxu1 %v199_v33 }
  0x80   : > { %686 = vmatmul.mubr.f32.gmra.mrb[4].mxu0 %v184_v34  ;;  %710 = vmatmul.mubr.f32.gmra.mrb[4].mxu1 %v200_v35 }
  0x81   : > { %688 = vmatprep.mubr.f32.mxu0 %v185_v36  ;;  %712 = vmatprep.mubr.f32.mxu1 %v201_v37 }
  0x84   : > { %689 = vmatmul.mubr.f32.gmra.mrb[6].mxu0 %v186_v38  ;;  %713 = vmatmul.mubr.f32.gmra.mrb[6].mxu1 %v202_v39 }
  0x85   : > { %691 = vmatprep.mubr.f32.mxu0 %v187_v40  ;;  %715 = vmatprep.mubr.f32.mxu1 %v203_v41 }
  0x88   : > { %692 = vmatmul.mubr.f32.gmra.mrb[8].mxu0 %v188_v42  ;;  %716 = vmatmul.mubr.f32.gmra.mrb[8].mxu1 %v204_v43 }
  0x89   : > { %694 = vmatprep.mubr.f32.mxu0 %v189_v44  ;;  %718 = vmatprep.mubr.f32.mxu1 %v205_v45 }
  0x8c   : > { %695 = vmatmul.mubr.f32.gmra.mrb[10].mxu0 %v190_v46  ;;  %719 = vmatmul.mubr.f32.gmra.mrb[10].mxu1 %v206_v47 }
  0x8d   : > { %697 = vmatprep.mubr.f32.mxu0 %v191_v48  ;;  %721 = vmatprep.mubr.f32.mxu1 %v207_v49 }
  0x90   : > { %698 = vmatmul.mubr.f32.gmra.mrb[12].mxu0 %v192_v50  ;;  %722 = vmatmul.mubr.f32.gmra.mrb[12].mxu1 %v208_v51 }
  0x91   : > { %700 = vmatprep.mubr.f32.mxu0 %v193_v52  ;;  %724 = vmatprep.mubr.f32.mxu1 %v209_v53 }
  0x94   : > { %701 = vmatmul.mubr.f32.gmra.mrb[14].mxu0 %v194_v54  ;;  %725 = vmatmul.mubr.f32.gmra.mrb[14].mxu1 %v210_v55 }
 0x14b   : > { %v681_v56 = vpop.f32.mrb[0].mxu0  ;;  %v705_v57 = vpop.f32.mrb[0].mxu1 }
 0x14c   : > { %453 = vst [vmem:[%s1183_s15 + $0x8] sm:$0xff] %v681_v56  ;;  %469 = vst [vmem:[%s1183_s15 + $0x88] sm:$0xff] %v705_v57  ;;  %v293_v58 = vpop.f32.mrb[1].mxu0  ;;  %v373_v59 = vpop.f32.mrb[1].mxu1 }
 0x14d   : > { %452 = vst [vmem:[%s1183_s15] sm:$0xff] %v293_v58  ;;  %468 = vst [vmem:[%s1183_s15 + $0x80] sm:$0xff] %v373_v59 }
 0x14f   : > { %v684_v60 = vpop.f32.mrb[2].mxu0  ;;  %v708_v61 = vpop.f32.mrb[2].mxu1 }
 0x150   : > { %455 = vst [vmem:[%s1183_s15 + $0x18] sm:$0xff] %v684_v60  ;;  %471 = vst [vmem:[%s1183_s15 + $0x98] sm:$0xff] %v708_v61  ;;  %v303_v62 = vpop.f32.mrb[3].mxu0  ;;  %v383_v63 = vpop.f32.mrb[3].mxu1 }
 0x151   : > { %454 = vst [vmem:[%s1183_s15 + $0x10] sm:$0xff] %v303_v62  ;;  %470 = vst [vmem:[%s1183_s15 + $0x90] sm:$0xff] %v383_v63 }
 0x153   : > { %v687_v0 = vpop.f32.mrb[4].mxu0  ;;  %v711_v1 = vpop.f32.mrb[4].mxu1 }
 0x154   : > { %457 = vst [vmem:[%s1183_s15 + $0x28] sm:$0xff] %v687_v0  ;;  %473 = vst [vmem:[%s1183_s15 + $0xa8] sm:$0xff] %v711_v1  ;;  %v313_v2 = vpop.f32.mrb[5].mxu0  ;;  %v393_v3 = vpop.f32.mrb[5].mxu1 }
 0x155   : > { %456 = vst [vmem:[%s1183_s15 + $0x20] sm:$0xff] %v313_v2  ;;  %472 = vst [vmem:[%s1183_s15 + $0xa0] sm:$0xff] %v393_v3 }
 0x157   : > { %v690_v4 = vpop.f32.mrb[6].mxu0  ;;  %v714_v5 = vpop.f32.mrb[6].mxu1 }
 0x158   : > { %459 = vst [vmem:[%s1183_s15 + $0x38] sm:$0xff] %v690_v4  ;;  %475 = vst [vmem:[%s1183_s15 + $0xb8] sm:$0xff] %v714_v5  ;;  %v323_v6 = vpop.f32.mrb[7].mxu0  ;;  %v403_v7 = vpop.f32.mrb[7].mxu1 }
 0x159   : > { %458 = vst [vmem:[%s1183_s15 + $0x30] sm:$0xff] %v323_v6  ;;  %474 = vst [vmem:[%s1183_s15 + $0xb0] sm:$0xff] %v403_v7 }
 0x15b   : > { %v693_v8 = vpop.f32.mrb[8].mxu0  ;;  %v717_v9 = vpop.f32.mrb[8].mxu1 }
 0x15c   : > { %461 = vst [vmem:[%s1183_s15 + $0x48] sm:$0xff] %v693_v8  ;;  %477 = vst [vmem:[%s1183_s15 + $0xc8] sm:$0xff] %v717_v9  ;;  %v333_v10 = vpop.f32.mrb[9].mxu0  ;;  %v413_v11 = vpop.f32.mrb[9].mxu1 }
 0x15d   : > { %460 = vst [vmem:[%s1183_s15 + $0x40] sm:$0xff] %v333_v10  ;;  %476 = vst [vmem:[%s1183_s15 + $0xc0] sm:$0xff] %v413_v11 }
 0x15f   : > { %v696_v12 = vpop.f32.mrb[10].mxu0  ;;  %v720_v13 = vpop.f32.mrb[10].mxu1 }
 0x160   : > { %463 = vst [vmem:[%s1183_s15 + $0x58] sm:$0xff] %v696_v12  ;;  %479 = vst [vmem:[%s1183_s15 + $0xd8] sm:$0xff] %v720_v13  ;;  %v343_v14 = vpop.f32.mrb[11].mxu0  ;;  %v423_v15 = vpop.f32.mrb[11].mxu1 }
 0x161   : > { %462 = vst [vmem:[%s1183_s15 + $0x50] sm:$0xff] %v343_v14  ;;  %478 = vst [vmem:[%s1183_s15 + $0xd0] sm:$0xff] %v423_v15 }
 0x163   : > { %v699_v16 = vpop.f32.mrb[12].mxu0  ;;  %v723_v17 = vpop.f32.mrb[12].mxu1 }
 0x164   : > { %465 = vst [vmem:[%s1183_s15 + $0x68] sm:$0xff] %v699_v16  ;;  %481 = vst [vmem:[%s1183_s15 + $0xe8] sm:$0xff] %v723_v17  ;;  %v353_v18 = vpop.f32.mrb[13].mxu0  ;;  %v433_v19 = vpop.f32.mrb[13].mxu1 }
 0x165   : > { %464 = vst [vmem:[%s1183_s15 + $0x60] sm:$0xff] %v353_v18  ;;  %480 = vst [vmem:[%s1183_s15 + $0xe0] sm:$0xff] %v433_v19 }
 0x167   : > { %v702_v20 = vpop.f32.mrb[14].mxu0  ;;  %v726_v21 = vpop.f32.mrb[14].mxu1 }
 0x168   : > { %467 = vst [vmem:[%s1183_s15 + $0x78] sm:$0xff] %v702_v20  ;;  %483 = vst [vmem:[%s1183_s15 + $0xf8] sm:$0xff] %v726_v21  ;;  %v363_v22 = vpop.f32.mrb[15].mxu0  ;;  %v443_v23 = vpop.f32.mrb[15].mxu1 }
 0x169   : > { %466 = vst [vmem:[%s1183_s15 + $0x70] sm:$0xff] %v363_v22  ;;  %482 = vst [vmem:[%s1183_s15 + $0xf0] sm:$0xff] %v443_v23 }
 0x16a   : > { %907 = shalt.err (!%p904_p7)
}
 0x16b   : > { %s908_s20 = scalar_lea.hbm %s1218_s22, 4096  ;;  %s912_s25 = scalar_lea.hbm %s1270_s2, 8192 }
 0x16c   : > { %p909_p9 = scmp.ne.s32.totalorder %s1218_s22, %s908_s20  ;;  %p913_p5 = scmp.lt.u32.totalorder %s1218_s22, %s1270_s2 }
 0x16d   : > { %p914_p11 = scmp.lt.u32.totalorder %s912_s25, %s908_s20  ;;  %p916_p4 = scmp.lt.u32.totalorder %s908_s20, %s1218_s22 }
 0x16e   : > { %p910_p1 = pnand %p909_p9, %p1082_p12 }
 0x16f   : > { %p915_p2 = por %p914_p11, %p913_p5 }
 0x170   : > { %p911_p0 = pneg %p910_p1 }
 0x171   : > { %p917_p6 = por %p916_p4, %p915_p2 }
 0x173   : > { %p918_p8 = pnand %p917_p6, %p911_p0 }
 0x175   : > { %921 = shalt.err (!%p918_p8)
}
 0x176   : > { %s971_s30 = smov 128   ;;  %s972_s23 = smov 8  }
 0x177   : > { %781 = dma.vmem_to_hbm [thread:$0]  (%p1082_p12), %s1220_s4, 4096, %s1218_s22, %s485_s13, %s971_s30, %s971_s30, %s972_s23  }
 0x178 PF: > { %s513_s15 = sand.u32 1, %s952_s9   ;;  %p1285_p10 = scmp.ne.s32.totalorder %s1275_s16, 0 }
 0x179   : > { %p1286_p13 = scmp.ge.s32.totalorder %s964_s12, 2  ;;  %s514_s17 = scalar_lea.sflag [#allocation4], %s513_s15 }
 0x17b   : > { %p792_p3 = pnand %p1286_p13, %p1285_p10 }
 0x17d   : > { %947 = dma.done.wait (!%p792_p3), %s514_s17, 4096  }
 0x17e   : > { %949 = vsyncadd (!%p792_p3), %s514_s17, 4294963200  ;;  %p16_p7 = scmp.ge.s32.totalorder %s1044_s21, 4   ;;  %s1287_s9 = smov %s956_s10 }
 0x17f   : > { %s1288_s10 = smov %s960_s11  ;;  %s1289_s11 = smov %s1078_s8 }
 0x180   : > { %s1290_s12 = smov %s1044_s21  ;;  %18 = sbr.rel (!%p16_p7) target bundleno = 6 (0x6), region = 77 }
 0x187   :  { %519 = vsyncpa [#allocation3], 1 }
 0x188   :  { %521 = vsyncpa [#allocation3 + $0x1], 1 }
 0x189   :  { %522 = vsyncpa [#allocation6], 1 }
 0x18a   :  { %523 = vsyncpa [#allocation4], 1 }
 0x18b   :  { %525 = vsyncpa [#allocation4 + $0x1], 1 }

</bundles_post_ra>
